<compile_context>
chip_gen: v5e
topology: v5e:2x2
jax: 0.10.0
libtpu: 0.0.40
codegen_flags: <defaults>
</compile_context>

<pallas_src>
import functools

import jax
import jax.numpy as jnp
from jax.experimental import pallas as pl
from jax.experimental.pallas import tpu as pltpu


def conv_block_kernel(x_ref, w_ref, bn_ref, b_ref, o_ref, *, h, w):
    # x_ref:  (NB, Cin_pad, H*W)   flattened-NCHW input block (lane-dense)
    # w_ref:  (Cout, 9*Cin_pad)    im2col weights, columns ordered (kh, kw, ci)
    # bn_ref: (Cin_pad, 2)         col0 = gamma/sqrt(var+eps), col1 = beta - mean*scale
    # b_ref:  (Cout, 1)            conv bias (epilogue add, not an extra K column)
    # o_ref:  (NB, Cout, H*W)      flattened-NCHW output block (lane-dense)
    nb, cin, _ = x_ref.shape
    hw = h * w

    # Fused BatchNorm (running stats) + ReLU for the whole block at once.
    bn = bn_ref[...]
    scale = bn[:, 0:1][None]                 # (1, Cin_pad, 1) broadcast
    shift = bn[:, 1:2][None]
    xn = jnp.maximum(x_ref[...] * scale + shift, 0.0)      # (NB, Cin_pad, HW)
    # Rows = (image, channel); Cin_pad is a multiple of 8 so this merge is layout-free.
    xn = xn.reshape(nb * cin, hw)

    # Hoisted lane-index masks marking columns whose flat shift crosses a row boundary
    # (emulates circular W-wrap on the flattened spatial axis).
    col = jax.lax.broadcasted_iota(jnp.int32, (1, hw), 1) % w
    at_left = jnp.broadcast_to(col == 0, (nb * cin, hw))        # w == 0
    at_right = jnp.broadcast_to(col == (w - 1), (nb * cin, hw))  # w == W-1

    # Circularly shifted copies on the flattened spatial axis, deduplicated by offset.
    # flat_shift(off)[r, p] == xn[r, (p + off) mod (H*W)]; each distinct offset is one
    # XLU lane-rotate (pltpu.roll), 13 total, and the XLU slot is otherwise idle here.
    shifted = {0: xn}

    def flat_shift(off):
        key = off % hw
        if key not in shifted:
            shifted[key] = pltpu.roll(xn, hw - key, axis=1)   # == jnp.roll(xn, -key)
        return shifted[key]

    # Tap order (kh, kw) matches w_ref column order (kh, kw, ci).  The flat shift by
    # dh*W + dw is exact except where the W index wraps; fixed with one select per side
    # (circular padding fully in-kernel -> no wrapper-side pad / extra HBM traffic).
    taps = []
    for dh in (-1, 0, 1):                                     # kh = 0, 1, 2
        center = flat_shift(dh * w)                                            # kw=1
        left = jnp.where(at_left,
                         flat_shift(dh * w - 1 + w), flat_shift(dh * w - 1))   # kw=0
        right = jnp.where(at_right,
                          flat_shift(dh * w + 1 - w), flat_shift(dh * w + 1))  # kw=2
        taps.extend([left, center, right])

    # Pack rhs = (9*Cin_pad, NB*HW): per tap, lane-concat the per-image row blocks
    # (static 8-aligned sublane slices, lane concat at HW-multiple-of-128 boundaries ->
    # pure vreg re-ordering), then sublane-concat the 9 aligned tap chunks.
    rhs = jnp.concatenate(
        [jnp.concatenate([t[b * cin:(b + 1) * cin, :] for b in range(nb)], axis=1)
         for t in taps],
        axis=0)                                               # (9*Cin_pad, NB*HW)

    # ONE wide MXU matmul for the whole block: (Cout, 9*Cin_pad) x (9*Cin_pad, NB*HW).
    # Operands kept f32 for exactness vs the f32 reference; cast rhs/w_ref to bfloat16
    # (keeping preferred_element_type=f32) on v6e/v7x when channel counts are scaled up.
    acc = jnp.dot(w_ref[...], rhs, preferred_element_type=jnp.float32)
    acc = acc + b_ref[...]                                    # epilogue bias (VPU filler)

    # Lane-dense stores, one static 128-aligned lane slice per image.
    for b in range(nb):
        o_ref[b] = acc[:, b * hw:(b + 1) * hw].astype(o_ref.dtype)


def _default_batch_block(n):
    """One fat grid step per TensorCore: 2 TCs behind one device on v7x/v4/v5p,
    1 TC on v5e/v6e (where the grid is a serial loop and per-step overhead dominates)."""
    try:
        kind = jax.devices()[0].device_kind.lower()
    except Exception:
        kind = ""
    two_tc = any(tag in kind for tag in ("v7", "7x", "v4", "v5p"))
    if two_tc and n % 2 == 0:
        return n // 2          # grid=(2,), "parallel" -> one step per TensorCore
    return n                   # single TC: collapse the grid to one step


def conv_block_forward(x_nchw, conv_w, conv_b, gamma, beta, run_mean, run_var,
                       eps=1e-5, batch_block=None):
    """x_nchw: (N, Cin, H, W).  conv_w: (Cout, Cin, 3, 3).  Returns (N, Cout, H, W)."""
    N, Cin, H, W = x_nchw.shape
    Cout = conv_w.shape[0]
    HW = H * W
    cin_pad = ((Cin + 7) // 8) * 8        # sublane-align channel chunks (f32 tile = 8)

    if batch_block is None:
        batch_block = _default_batch_block(N)
    assert N % batch_block == 0, "batch_block must divide the batch size"

    # Free reshape only (no NHWC transpose, no circular jnp.pad).  Zero-pad channels to
    # the sublane tile so every im2col chunk lands at an 8-aligned offset in rhs.
    x_flat = x_nchw.reshape(N, Cin, HW).astype(jnp.float32)
    if cin_pad != Cin:
        x_flat = jnp.pad(x_flat, ((0, 0), (0, cin_pad - Cin), (0, 0)))

    # BN running stats folded into per-channel scale/shift, merged into one (Cin_pad, 2)
    # operand (single small DMA).  Padded channels get scale=shift=0 -> stay exactly 0.
    inv_std = gamma / jnp.sqrt(run_var + eps)
    bn = jnp.stack([inv_std, beta - run_mean * inv_std], axis=1).astype(jnp.float32)
    if cin_pad != Cin:
        bn = jnp.pad(bn, ((0, cin_pad - Cin), (0, 0)))

    # im2col weights: columns ordered (kh, kw, ci) over padded channels; K = 9*Cin_pad
    # stays sublane-aligned because the bias is an epilogue add, not an extra column.
    w_p = conv_w.astype(jnp.float32)
    if cin_pad != Cin:
        w_p = jnp.pad(w_p, ((0, 0), (0, cin_pad - Cin), (0, 0), (0, 0)))
    w2 = jnp.transpose(w_p, (0, 2, 3, 1)).reshape(Cout, 9 * cin_pad)
    bias = conv_b.reshape(Cout, 1).astype(jnp.float32)

    kernel = functools.partial(conv_block_kernel, h=H, w=W)

    # TODO(synk): for scaled-up H*W / Cin, tile the spatial axis with a +/-W halo and set
    # vmem_limit_bytes explicitly (v7x has only 64 MiB VMEM); unnecessary at these sizes.
    out_flat = pl.pallas_call(
        kernel,
        out_shape=jax.ShapeDtypeStruct((N, Cout, HW), jnp.float32),
        grid_spec=pltpu.PrefetchScalarGridSpec(
            num_scalar_prefetch=0,
            grid=(N // batch_block,),
            in_specs=[
                pl.BlockSpec((batch_block, cin_pad, HW), lambda n: (n, 0, 0)),
                pl.BlockSpec((Cout, 9 * cin_pad), lambda n: (0, 0)),
                pl.BlockSpec((cin_pad, 2), lambda n: (0, 0)),
                pl.BlockSpec((Cout, 1), lambda n: (0, 0)),
            ],
            out_specs=pl.BlockSpec((batch_block, Cout, HW), lambda n: (n, 0, 0)),
        ),
        compiler_params=pltpu.CompilerParams(
            dimension_semantics=("parallel",)),
    )(x_flat, w2, bn, bias)

    return out_flat.reshape(N, Cout, H, W)


def reference_forward(x_nchw, conv_w, conv_b, gamma, beta, run_mean, run_var,
                      eps=1e-5):
    """Pure-JAX reference (inference BN + ReLU + circular 3x3 conv)."""
    xn = (x_nchw - run_mean[None, :, None, None]) / jnp.sqrt(
        run_var[None, :, None, None] + eps)
    xn = xn * gamma[None, :, None, None] + beta[None, :, None, None]
    xn = jnp.maximum(xn, 0.0)
    xp = jnp.pad(xn, ((0, 0), (0, 0), (1, 1), (1, 1)), mode="wrap")
    out = jax.lax.conv_general_dilated(
        xp, conv_w, window_strides=(1, 1), padding="VALID",
        dimension_numbers=("NCHW", "OIHW", "NCHW"))
    return out + conv_b[None, :, None, None]


if __name__ == "__main__":
    # small shapes consistent with the module: batch=2, input_dim=4, output_dim=8, 16x16
    N, Cin, Cout, H, W = 2, 4, 8, 16, 16

    key = jax.random.PRNGKey(0)
    kx, kw, kb, kg, kbeta, km, kv = jax.random.split(key, 7)

    x = jax.random.normal(kx, (N, Cin, H, W), dtype=jnp.float32)

    # Conv2d(input_dim, output_dim, (3,3)) parameters (xavier-normal-ish weights)
    fan_in, fan_out = Cin * 9, Cout * 9
    std = (2.0 / (fan_in + fan_out)) ** 0.5
    conv_w = std * jax.random.normal(kw, (Cout, Cin, 3, 3), dtype=jnp.float32)
    conv_b = 0.1 * jax.random.normal(kb, (Cout,), dtype=jnp.float32)

    # BatchNorm2d(input_dim) parameters / running stats
    gamma = 1.0 + 0.1 * jax.random.normal(kg, (Cin,), dtype=jnp.float32)
    beta = 0.1 * jax.random.normal(kbeta, (Cin,), dtype=jnp.float32)
    run_mean = 0.1 * jax.random.normal(km, (Cin,), dtype=jnp.float32)
    run_var = 1.0 + 0.1 * jnp.abs(jax.random.normal(kv, (Cin,), dtype=jnp.float32))

    out = conv_block_forward(x, conv_w, conv_b, gamma, beta, run_mean, run_var)
    out = jax.block_until_ready(out)

    ref = reference_forward(x, conv_w, conv_b, gamma, beta, run_mean, run_var)
    assert out.shape == (N, Cout, H, W)
    assert jnp.allclose(out, ref, atol=2e-4, rtol=2e-4), "mismatch vs reference"

    print("KERNEL_OK")
</pallas_src>

<mosaic_0001>
module attributes {stable_mosaic.version = 11 : i64} {
  func.func @conv_block_kernel(%arg0: i32, %arg1: memref<2x8x256xf32, #tpu.memory_space<vmem>>, %arg2: memref<8x72xf32, #tpu.memory_space<vmem>>, %arg3: memref<8x2xf32, #tpu.memory_space<vmem>>, %arg4: memref<8x1xf32, #tpu.memory_space<vmem>>, %arg5: memref<2x8x256xf32, #tpu.memory_space<vmem>>) attributes {dimension_semantics = [#tpu.dimension_semantics<parallel>], iteration_bounds = array<i64: 1>, scalar_prefetch = 0 : i64, scratch_operands = 0 : i64, tpu.core_type = #tpu.core_type<tc>, window_params = [{transform_indices = @transform_0, window_bounds = array<i64: 2, 8, 256>}, {pipeline_mode = #tpu.pipeline_mode<synchronous>, transform_indices = @transform_1, window_bounds = array<i64: 8, 72>}, {pipeline_mode = #tpu.pipeline_mode<synchronous>, transform_indices = @transform_2, window_bounds = array<i64: 8, 2>}, {pipeline_mode = #tpu.pipeline_mode<synchronous>, transform_indices = @transform_3, window_bounds = array<i64: 8, 1>}, {transform_indices = @transform_4, window_bounds = array<i64: 2, 8, 256>}]} {
    %c0 = arith.constant 0 : index
    %c0_0 = arith.constant 0 : index
    %0 = vector.load %arg3[%c0, %c0_0] : memref<8x2xf32, #tpu.memory_space<vmem>>, vector<8x2xf32>
    %1 = vector.extract_strided_slice %0 {offsets = [0, 0], sizes = [8, 1], strides = [1, 1]} : vector<8x2xf32> to vector<8x1xf32>
    %2 = vector.shape_cast %1 : vector<8x1xf32> to vector<1x8x1xf32>
    %3 = vector.extract_strided_slice %0 {offsets = [0, 1], sizes = [8, 1], strides = [1, 1]} : vector<8x2xf32> to vector<8x1xf32>
    %4 = vector.shape_cast %3 : vector<8x1xf32> to vector<1x8x1xf32>
    %c0_1 = arith.constant 0 : index
    %c0_2 = arith.constant 0 : index
    %c0_3 = arith.constant 0 : index
    %5 = vector.load %arg1[%c0_1, %c0_2, %c0_3] : memref<2x8x256xf32, #tpu.memory_space<vmem>>, vector<2x8x256xf32>
    %6 = vector.broadcast %2 : vector<1x8x1xf32> to vector<2x8x256xf32>
    %7 = arith.mulf %5, %6 : vector<2x8x256xf32>
    %8 = vector.broadcast %4 : vector<1x8x1xf32> to vector<2x8x256xf32>
    %9 = arith.addf %7, %8 : vector<2x8x256xf32>
    %cst = arith.constant 0.000000e+00 : f32
    %10 = vector.broadcast %cst : f32 to vector<2x8x256xf32>
    %11 = arith.maximumf %9, %10 : vector<2x8x256xf32>
    %12 = vector.shape_cast %11 : vector<2x8x256xf32> to vector<16x256xf32>
    %13 = tpu.iota {dimensions = array<i32: 1>} : vector<1x256xi32>
    %c16_i32 = arith.constant 16 : i32
    %c0_i32 = arith.constant 0 : i32
    %14 = arith.cmpi eq, %c16_i32, %c0_i32 : i32
    %c1_i32 = arith.constant 1 : i32
    %15 = arith.select %14, %c1_i32, %c16_i32 : i32
    %16 = vector.broadcast %15 : i32 to vector<1x256xi32>
    %17 = arith.remsi %13, %16 : vector<1x256xi32>
    %c0_i32_4 = arith.constant 0 : i32
    %18 = vector.broadcast %c0_i32_4 : i32 to vector<1x256xi32>
    %19 = arith.cmpi ne, %17, %18 : vector<1x256xi32>
    %c0_i32_5 = arith.constant 0 : i32
    %20 = vector.broadcast %c0_i32_5 : i32 to vector<1x256xi32>
    %21 = arith.cmpi slt, %17, %20 : vector<1x256xi32>
    %c0_i32_6 = arith.constant 0 : i32
    %22 = arith.cmpi slt, %15, %c0_i32_6 : i32
    %23 = vector.broadcast %22 : i1 to vector<1x256xi1>
    %24 = vector.broadcast %23 : vector<1x256xi1> to vector<1x256xi1>
    %25 = arith.xori %21, %24 : vector<1x256xi1>
    %26 = arith.andi %25, %19 : vector<1x256xi1>
    %27 = vector.broadcast %15 : i32 to vector<1x256xi32>
    %28 = arith.addi %17, %27 : vector<1x256xi32>
    %29 = arith.select %26, %28, %17 : vector<1x256xi1>, vector<1x256xi32>
    %c0_i32_7 = arith.constant 0 : i32
    %30 = vector.broadcast %c0_i32_7 : i32 to vector<1x256xi32>
    %31 = arith.cmpi eq, %29, %30 : vector<1x256xi32>
    %32 = vector.shape_cast %31 : vector<1x256xi1> to vector<1x256xi1>
    %33 = vector.broadcast %32 : vector<1x256xi1> to vector<16x256xi1>
    %c15_i32 = arith.constant 15 : i32
    %34 = vector.broadcast %c15_i32 : i32 to vector<1x256xi32>
    %35 = arith.cmpi eq, %29, %34 : vector<1x256xi32>
    %36 = vector.shape_cast %35 : vector<1x256xi1> to vector<1x256xi1>
    %37 = vector.broadcast %36 : vector<1x256xi1> to vector<16x256xi1>
    %c16_i32_8 = arith.constant 16 : i32
    %38 = tpu.dynamic_rotate %12 by %c16_i32_8 dim 1 : vector<16x256xf32>, i32 -> vector<16x256xf32>
    %c1_i32_9 = arith.constant 1 : i32
    %39 = tpu.dynamic_rotate %12 by %c1_i32_9 dim 1 : vector<16x256xf32>, i32 -> vector<16x256xf32>
    %c17_i32 = arith.constant 17 : i32
    %40 = tpu.dynamic_rotate %12 by %c17_i32 dim 1 : vector<16x256xf32>, i32 -> vector<16x256xf32>
    %41 = arith.select %33, %39, %40 : vector<16x256xi1>, vector<16x256xf32>
    %c31_i32 = arith.constant 31 : i32
    %42 = tpu.dynamic_rotate %12 by %c31_i32 dim 1 : vector<16x256xf32>, i32 -> vector<16x256xf32>
    %c15_i32_10 = arith.constant 15 : i32
    %43 = tpu.dynamic_rotate %12 by %c15_i32_10 dim 1 : vector<16x256xf32>, i32 -> vector<16x256xf32>
    %44 = arith.select %37, %42, %43 : vector<16x256xi1>, vector<16x256xf32>
    %c241_i32 = arith.constant 241 : i32
    %45 = tpu.dynamic_rotate %12 by %c241_i32 dim 1 : vector<16x256xf32>, i32 -> vector<16x256xf32>
    %46 = arith.select %33, %45, %39 : vector<16x256xi1>, vector<16x256xf32>
    %c255_i32 = arith.constant 255 : i32
    %47 = tpu.dynamic_rotate %12 by %c255_i32 dim 1 : vector<16x256xf32>, i32 -> vector<16x256xf32>
    %48 = arith.select %37, %43, %47 : vector<16x256xi1>, vector<16x256xf32>
    %c240_i32 = arith.constant 240 : i32
    %49 = tpu.dynamic_rotate %12 by %c240_i32 dim 1 : vector<16x256xf32>, i32 -> vector<16x256xf32>
    %c225_i32 = arith.constant 225 : i32
    %50 = tpu.dynamic_rotate %12 by %c225_i32 dim 1 : vector<16x256xf32>, i32 -> vector<16x256xf32>
    %51 = arith.select %33, %50, %45 : vector<16x256xi1>, vector<16x256xf32>
    %c239_i32 = arith.constant 239 : i32
    %52 = tpu.dynamic_rotate %12 by %c239_i32 dim 1 : vector<16x256xf32>, i32 -> vector<16x256xf32>
    %53 = arith.select %37, %47, %52 : vector<16x256xi1>, vector<16x256xf32>
    %54 = vector.extract_strided_slice %41 {offsets = [0, 0], sizes = [8, 256], strides = [1, 1]} : vector<16x256xf32> to vector<8x256xf32>
    %55 = vector.extract_strided_slice %41 {offsets = [8, 0], sizes = [8, 256], strides = [1, 1]} : vector<16x256xf32> to vector<8x256xf32>
    %56 = tpu.concatenate %54, %55 in 1 : vector<8x256xf32>, vector<8x256xf32> -> vector<8x512xf32>
    %57 = vector.extract_strided_slice %38 {offsets = [0, 0], sizes = [8, 256], strides = [1, 1]} : vector<16x256xf32> to vector<8x256xf32>
    %58 = vector.extract_strided_slice %38 {offsets = [8, 0], sizes = [8, 256], strides = [1, 1]} : vector<16x256xf32> to vector<8x256xf32>
    %59 = tpu.concatenate %57, %58 in 1 : vector<8x256xf32>, vector<8x256xf32> -> vector<8x512xf32>
    %60 = vector.extract_strided_slice %44 {offsets = [0, 0], sizes = [8, 256], strides = [1, 1]} : vector<16x256xf32> to vector<8x256xf32>
    %61 = vector.extract_strided_slice %44 {offsets = [8, 0], sizes = [8, 256], strides = [1, 1]} : vector<16x256xf32> to vector<8x256xf32>
    %62 = tpu.concatenate %60, %61 in 1 : vector<8x256xf32>, vector<8x256xf32> -> vector<8x512xf32>
    %63 = vector.extract_strided_slice %46 {offsets = [0, 0], sizes = [8, 256], strides = [1, 1]} : vector<16x256xf32> to vector<8x256xf32>
    %64 = vector.extract_strided_slice %46 {offsets = [8, 0], sizes = [8, 256], strides = [1, 1]} : vector<16x256xf32> to vector<8x256xf32>
    %65 = tpu.concatenate %63, %64 in 1 : vector<8x256xf32>, vector<8x256xf32> -> vector<8x512xf32>
    %66 = vector.extract_strided_slice %12 {offsets = [0, 0], sizes = [8, 256], strides = [1, 1]} : vector<16x256xf32> to vector<8x256xf32>
    %67 = vector.extract_strided_slice %12 {offsets = [8, 0], sizes = [8, 256], strides = [1, 1]} : vector<16x256xf32> to vector<8x256xf32>
    %68 = tpu.concatenate %66, %67 in 1 : vector<8x256xf32>, vector<8x256xf32> -> vector<8x512xf32>
    %69 = vector.extract_strided_slice %48 {offsets = [0, 0], sizes = [8, 256], strides = [1, 1]} : vector<16x256xf32> to vector<8x256xf32>
    %70 = vector.extract_strided_slice %48 {offsets = [8, 0], sizes = [8, 256], strides = [1, 1]} : vector<16x256xf32> to vector<8x256xf32>
    %71 = tpu.concatenate %69, %70 in 1 : vector<8x256xf32>, vector<8x256xf32> -> vector<8x512xf32>
    %72 = vector.extract_strided_slice %51 {offsets = [0, 0], sizes = [8, 256], strides = [1, 1]} : vector<16x256xf32> to vector<8x256xf32>
    %73 = vector.extract_strided_slice %51 {offsets = [8, 0], sizes = [8, 256], strides = [1, 1]} : vector<16x256xf32> to vector<8x256xf32>
    %74 = tpu.concatenate %72, %73 in 1 : vector<8x256xf32>, vector<8x256xf32> -> vector<8x512xf32>
    %75 = vector.extract_strided_slice %49 {offsets = [0, 0], sizes = [8, 256], strides = [1, 1]} : vector<16x256xf32> to vector<8x256xf32>
    %76 = vector.extract_strided_slice %49 {offsets = [8, 0], sizes = [8, 256], strides = [1, 1]} : vector<16x256xf32> to vector<8x256xf32>
    %77 = tpu.concatenate %75, %76 in 1 : vector<8x256xf32>, vector<8x256xf32> -> vector<8x512xf32>
    %78 = vector.extract_strided_slice %53 {offsets = [0, 0], sizes = [8, 256], strides = [1, 1]} : vector<16x256xf32> to vector<8x256xf32>
    %79 = vector.extract_strided_slice %53 {offsets = [8, 0], sizes = [8, 256], strides = [1, 1]} : vector<16x256xf32> to vector<8x256xf32>
    %80 = tpu.concatenate %78, %79 in 1 : vector<8x256xf32>, vector<8x256xf32> -> vector<8x512xf32>
    %81 = tpu.concatenate %56, %59, %62, %65, %68, %71, %74, %77, %80 in 0 : vector<8x512xf32>, vector<8x512xf32>, vector<8x512xf32>, vector<8x512xf32>, vector<8x512xf32>, vector<8x512xf32>, vector<8x512xf32>, vector<8x512xf32>, vector<8x512xf32> -> vector<72x512xf32>
    %c0_11 = arith.constant 0 : index
    %c0_12 = arith.constant 0 : index
    %82 = vector.load %arg2[%c0_11, %c0_12] : memref<8x72xf32, #tpu.memory_space<vmem>>, vector<8x72xf32>
    %cst_13 = arith.constant dense<0.000000e+00> : vector<8x512xf32>
    %83 = tpu.matmul %82, %81, %cst_13 {dimension_numbers = #tpu.dot_dimension_numbers<[1], [0], [0], [1], [0, 0, 1, 1], [], []>} : vector<8x72xf32>, vector<72x512xf32>, vector<8x512xf32> -> vector<8x512xf32>
    %c0_14 = arith.constant 0 : index
    %c0_15 = arith.constant 0 : index
    %84 = vector.load %arg4[%c0_14, %c0_15] : memref<8x1xf32, #tpu.memory_space<vmem>>, vector<8x1xf32>
    %85 = vector.broadcast %84 : vector<8x1xf32> to vector<8x512xf32>
    %86 = arith.addf %83, %85 : vector<8x512xf32>
    %87 = vector.extract_strided_slice %86 {offsets = [0, 0], sizes = [8, 256], strides = [1, 1]} : vector<8x512xf32> to vector<8x256xf32>
    %c0_16 = arith.constant 0 : index
    %c0_17 = arith.constant 0 : index
    %c0_18 = arith.constant 0 : index
    %88 = vector.load %arg5[%c0_16, %c0_17, %c0_18] : memref<2x8x256xf32, #tpu.memory_space<vmem>>, vector<1x8x256xf32>
    %89 = vector.shape_cast %88 : vector<1x8x256xf32> to vector<8x256xf32>
    %90 = vector.shape_cast %87 : vector<8x256xf32> to vector<1x8x256xf32>
    tpu.vector_store %arg5[%c0_16, %c0_17, %c0_18], %90 {strides = array<i32>} : memref<2x8x256xf32, #tpu.memory_space<vmem>>, vector<1x8x256xf32>,
    %91 = vector.extract_strided_slice %86 {offsets = [0, 256], sizes = [8, 256], strides = [1, 1]} : vector<8x512xf32> to vector<8x256xf32>
    %c1 = arith.constant 1 : index
    %c0_19 = arith.constant 0 : index
    %c0_20 = arith.constant 0 : index
    %92 = vector.load %arg5[%c1, %c0_19, %c0_20] : memref<2x8x256xf32, #tpu.memory_space<vmem>>, vector<1x8x256xf32>
    %93 = vector.shape_cast %92 : vector<1x8x256xf32> to vector<8x256xf32>
    %94 = vector.shape_cast %91 : vector<8x256xf32> to vector<1x8x256xf32>
    tpu.vector_store %arg5[%c1, %c0_19, %c0_20], %94 {strides = array<i32>} : memref<2x8x256xf32, #tpu.memory_space<vmem>>, vector<1x8x256xf32>,
    return
  }
  func.func @transform_0(%arg0: i32) -> (i32, i32, i32) {
    %c0_i32 = arith.constant 0 : i32
    %c0_i32_0 = arith.constant 0 : i32
    %c0_i32_1 = arith.constant 0 : i32
    return %arg0, %c0_i32, %c0_i32_0 : i32, i32, i32
  }
  func.func @transform_1(%arg0: i32) -> (i32, i32) {
    %c0_i32 = arith.constant 0 : i32
    %c0_i32_0 = arith.constant 0 : i32
    %c0_i32_1 = arith.constant 0 : i32
    return %c0_i32, %c0_i32_0 : i32, i32
  }
  func.func @transform_2(%arg0: i32) -> (i32, i32) {
    %c0_i32 = arith.constant 0 : i32
    %c0_i32_0 = arith.constant 0 : i32
    %c0_i32_1 = arith.constant 0 : i32
    return %c0_i32, %c0_i32_0 : i32, i32
  }
  func.func @transform_3(%arg0: i32) -> (i32, i32) {
    %c0_i32 = arith.constant 0 : i32
    %c0_i32_0 = arith.constant 0 : i32
    %c0_i32_1 = arith.constant 0 : i32
    return %c0_i32, %c0_i32_0 : i32, i32
  }
  func.func @transform_4(%arg0: i32) -> (i32, i32, i32) {
    %c0_i32 = arith.constant 0 : i32
    %c0_i32_0 = arith.constant 0 : i32
    %c0_i32_1 = arith.constant 0 : i32
    return %arg0, %c0_i32, %c0_i32_0 : i32, i32, i32
  }
}

</mosaic_0001>

<bundles_post_ra>
// kernel: tpu_custom_call.1
= control target key start
LH: loop header
LB: loop body
LE: loop exit
PB: predicated region body
PF: predicated region fallthrough
CT: control target
= control target key end

     0   :  { %9 = vsyncpa [#allocation3], 0  ;;  %s820_s0 = inlined_call_operand.hbm [shape: f32[2,8,256], index: 0, kind: input, shape index: {}]   ;;  %s821_s1 = inlined_call_operand.vmem [shape: f32[8,72], index: 1, kind: input, shape index: {}]   ;;  %s822_s2 = inlined_call_operand.vmem [shape: f32[8,2], index: 2, kind: input, shape index: {}]   ;;  %s823_s3 = inlined_call_operand.vmem [shape: f32[8,1], index: 3, kind: input, shape index: {}]   ;;  %s824_s4 = inlined_call_operand.hbm [shape: f32[2,8,256], index: 4, kind: output, shape index: {}]  }
   0x1   :  { %10 = vsyncpa [#allocation4], 0  ;;  %s15_s17 = sshll.u32 %s820_s0, 4  ;;  %s543_s18 = smov [#allocation2]   ;;  %s16_s17 = int_to_ptr.hbm [resolvable:$true] %s15_s17 }
   0x2   :  { %s17_s19 = sshll.u32 %s543_s18, 4  ;;  %s544_s20 = smov 256   ;;  %s18_s19 = int_to_ptr.vmem [resolvable:$true] %s17_s19 }
   0x3   :  { %s545_s21 = smov 16  }
   0x4   :  { %23 = dma.hbm_to_vmem [thread:$0]  %s16_s17, 512, %s18_s19, [#allocation3], %s544_s20, %s544_s20, %s545_s21  }
   0x5   :  { %539 = dma.done.wait [#allocation3], 512  }
   0x6   :  { %540 = vsyncadd [#allocation3], 4294966784  ;;  %v546_v0 = vmov 0   ;;  %v34_v1 = vld [vmem:[%s822_s2] sm:$0xff]  ;;  %v547_v2 = vmov 1   ;;  %v36_v5 = vld [vmem:[#allocation2 + $0x8] sm:$0xff]  ;;  %v60_v26 = vlaneseq }
   0x7   :  { %387 = vset.pattern.permute.xlu0 %v546_v0  ;;  %489 = vset.pattern.permute.xlu2 %v546_v0  ;;  %v35_v4 = vld [vmem:[#allocation2] sm:$0xff]  ;;  %v37_v6 = vld [vmem:[#allocation2 + $0x10] sm:$0xff]  ;;  %v38_v7 = vld [vmem:[#allocation2 + $0x18] sm:$0xff]  ;;  %s548_s0 = smov 112   ;;  %s549_s2 = smov 127   ;;  %vm260_vm14 = vcmask 588800  }
   0x8   :  { %41 = vperm.xlu0 %387, %v34_v1   ;;  %s550_s24 = smov 113   ;;  %s551_s25 = smov 111   ;;  %v616_v28 = vand.u32 127, %v60_v26 }
   0x9   :  { %s552_s26 = smov 1   ;;  %s553_s27 = smov 15  }
   0xa   :  { %s554_s28 = smov 97   ;;  %s555_s29 = smov 31   ;;  %v62_v30 = vadd.s32 128, %v616_v28  ;;  %v67_v32 = vand.u32 15, %v616_v28  ;;  %vm197_vm0 = vcmp.lt.s32.totalorder %v616_v28, 127  ;;  %vm244_vm1 = vcmp.lt.s32.totalorder %v616_v28, 111 }
   0xb   :  { %s556_s30 = smov 17   ;;  %vm214_vm2 = vcmp.lt.s32.totalorder %v616_v28, 112  ;;  %vm180_vm5 = vcmp.lt.s32.totalorder %v616_v28, 113  ;;  %vm227_vm6 = vcmp.lt.s32.totalorder %v616_v28, 97  ;;  %vm163_vm7 = vcmp.lt.s32.totalorder %v616_v28, 15  ;;  %s355_s11 = sshll.u32 %s824_s4, 4  ;;  %s356_s11 = int_to_ptr.hbm [resolvable:$true] %s355_s11 }
   0xc   :  { %v74_v33 = vand.u32 15, %v62_v30  ;;  %vm627_vm3 = vcmp.eq.s32.totalorder %v67_v32, 15  ;;  %vm658_vm8 = vcmp.eq.s32.totalorder %v67_v32, 0  ;;  %vm120_vm10 = vcmp.lt.s32.totalorder %v616_v28, 1 }
   0xd   :  { %vm150_vm11 = vcmp.lt.s32.totalorder %v616_v28, 31  ;;  %vm107_vm12 = vcmp.lt.s32.totalorder %v616_v28, 16  ;;  %vm133_vm13 = vcmp.lt.s32.totalorder %v616_v28, 17 }
   0xe   :  { %vm631_vm4 = vcmp.eq.s32.totalorder %v74_v33, 15  ;;  %vm664_vm9 = vcmp.eq.s32.totalorder %v74_v33, 0 }
  0x10   :  { %388 = vset.pattern.permute.xlu0 %v547_v2 }
  0x11   :  { %49 = vperm.xlu0 %388, %v34_v1  }
  0x19   :  { %490 = vset.pattern.permute.xlu0 %v546_v0 }
  0x7a   :  { %v42_v3 = vpop.permute.xlu0 %41 }
  0x7b   :  { %v44_v8 = vmul.f32 %v42_v3, %v35_v4  ;;  %v45_v9 = vmul.f32 %v42_v3, %v36_v5  ;;  %v46_v10 = vmul.f32 %v42_v3, %v37_v6  ;;  %v47_v11 = vmul.f32 %v42_v3, %v38_v7 }
  0x83   :  { %v50_v12 = vpop.permute.xlu0 %49 }
  0x84   :  { %v592_v13 = vadd.f32 %v50_v12, %v44_v8  ;;  %v594_v14 = vadd.f32 %v50_v12, %v45_v9  ;;  %v596_v15 = vadd.f32 %v50_v12, %v46_v10  ;;  %v598_v16 = vadd.f32 %v50_v12, %v47_v11 }
  0x86   :  { %v56_v17 = vmax.f32 %v592_v13, 0.0  ;;  %v57_v18 = vmax.f32 %v594_v14, 0.0  ;;  %v58_v19 = vmax.f32 %v596_v15, 0.0  ;;  %v59_v20 = vmax.f32 %v598_v16, 0.0 }
  0x88   :  { %v399_v21 = vpack.i.bf16 %v59_v20, %v58_v19  ;;  %v419_v22 = vpack.i.bf16 %v57_v18, %v56_v17 }
  0x8a   :  { %400 = vrot.lane.b32.xlu2 %v399_v21, %s548_s0  ;;  %390 = vrot.lane.b32.xlu1 %v399_v21, %s549_s2 }
  0x8b   :  { %420 = vrot.lane.b32.xlu0 %v419_v22, %s549_s2 }
  0x92   :  { %405 = vrot.lane.b32.xlu2 %v399_v21, %s550_s24  ;;  %395 = vrot.lane.b32.xlu1 %v399_v21, %s551_s25 }
  0x93   :  { %435 = vrot.lane.b32.xlu0 %v399_v21, %s552_s26 }
  0x9a   :  { %415 = vrot.lane.b32.xlu2 %v399_v21, %s553_s27  ;;  %410 = vrot.lane.b32.xlu1 %v399_v21, %s554_s28 }
  0x9b   :  { %450 = vrot.lane.b32.xlu0 %v399_v21, %s555_s29 }
  0xa2   :  { %430 = vrot.lane.b32.xlu2 %v419_v22, %s548_s0  ;;  %425 = vrot.lane.b32.xlu1 %v419_v22, %s551_s25 }
  0xa3   :  { %465 = vrot.lane.b32.xlu0 %v419_v22, %s552_s26 }
  0xaa   :  { %445 = vrot.lane.b32.xlu2 %v419_v22, %s554_s28  ;;  %440 = vrot.lane.b32.xlu1 %v419_v22, %s550_s24 }
  0xab   :  { %480 = vrot.lane.b32.xlu0 %v419_v22, %s545_s21 }
  0xb2   :  { %460 = vrot.lane.b32.xlu2 %v399_v21, %s545_s21  ;;  %455 = vrot.lane.b32.xlu1 %v419_v22, %s553_s27 }
  0xba   :  { %475 = vrot.lane.b32.xlu2 %v419_v22, %s555_s29  ;;  %470 = vrot.lane.b32.xlu1 %v399_v21, %s556_s30 }
  0xc2   :  { %485 = vrot.lane.b32.xlu1 %v419_v22, %s556_s30 }
  0xe4   :  { %v401_v23 = vpop.permute.xlu2 %400 }
  0xe5   :  { %v403_v40 = vunpack.i.h.bf16 %v401_v23  ;;  %v402_v41 = vunpack.i.l.bf16 %v401_v23 }
  0xe7   :  { %v216_v53 = vsel %vm214_vm2, %v402_v41, %v403_v40  ;;  %v218_v54 = vsel %vm214_vm2, %v403_v40, %v402_v41 }
  0xec   :  { %v406_v24 = vpop.permute.xlu2 %405 }
  0xed   :  { %v408_v50 = vunpack.i.h.bf16 %v406_v24  ;;  %v407_v51 = vunpack.i.l.bf16 %v406_v24 }
  0xef   :  { %v182_v61 = vsel %vm180_vm5, %v407_v51, %v408_v50  ;;  %v184_v63 = vsel %vm180_vm5, %v408_v50, %v407_v51 }
  0xf4   :  { %v614_v25 = vpop.permute.xlu2 %415 }
  0xf5   :  { %v418_v56 = vunpack.i.h.bf16 %v614_v25  ;;  %v417_v57 = vunpack.i.l.bf16 %v614_v25 }
  0xf7   :  { %v167_v9 = vsel %vm163_vm7, %v418_v56, %v417_v57  ;;  %v165_v10 = vsel %vm163_vm7, %v417_v57, %v418_v56 }
  0xfc   :  { %v391_v27 = vpop.permute.xlu1 %390  ;;  %v621_v31 = vpop.permute.xlu2 %430 }
  0xfd   :  { %v618_v29 = vpop.permute.xlu0 %420  ;;  %v393_v34 = vunpack.i.h.bf16 %v391_v27  ;;  %v392_v35 = vunpack.i.l.bf16 %v391_v27  ;;  %v433_v25 = vunpack.i.h.bf16 %v621_v31  ;;  %v432_v26 = vunpack.i.l.bf16 %v621_v31 }
  0xfe   :  { %v423_v7 = vunpack.i.h.bf16 %v618_v29  ;;  %v422_v8 = vunpack.i.l.bf16 %v618_v29 }
  0xff   :  { %v199_v44 = vsel %vm197_vm0, %v392_v35, %v393_v34  ;;  %v201_v46 = vsel %vm197_vm0, %v393_v34, %v392_v35 }
 0x100   :  { %v204_v21 = vsel %vm627_vm3, %v167_v9, %v199_v44  ;;  %v205_v22 = vsel %vm631_vm4, %v165_v10, %v201_v46  ;;  %v198_v33 = vsel %vm197_vm0, %v422_v8, %v423_v7  ;;  %v200_v34 = vsel %vm197_vm0, %v423_v7, %v422_v8 }
 0x104   :  { %v396_v36 = vpop.permute.xlu1 %395  ;;  %v647_v52 = vpop.permute.xlu2 %445 }
 0x105   :  { %v398_v37 = vunpack.i.h.bf16 %v396_v36  ;;  %v397_v38 = vunpack.i.l.bf16 %v396_v36  ;;  %v436_v39 = vpop.permute.xlu0 %435 }
 0x106   :  { %v438_v0 = vunpack.i.h.bf16 %v436_v39  ;;  %v437_v1 = vunpack.i.l.bf16 %v436_v39 }
 0x107   :  { %v246_v45 = vsel %vm244_vm1, %v397_v38, %v398_v37  ;;  %v248_v47 = vsel %vm244_vm1, %v398_v37, %v397_v38 }
 0x108   :  { %v251_v48 = vsel %vm627_vm3, %v199_v44, %v246_v45  ;;  %v252_v49 = vsel %vm631_vm4, %v201_v46, %v248_v47  ;;  %v691_v23 = vsel %vm120_vm10, %v438_v0, %v437_v1  ;;  %v695_v24 = vsel %vm120_vm10, %v437_v1, %v438_v0  ;;  %v254_v46 = vld [vmem:[%s823_s3] sm:$0xff] }
 0x109   :  { %311 = vmatpush.msra.mxu2 %v251_v48  ;;  %331 = vmatpush.msra.mxu3 %v252_v49  ;;  %v187_v31 = vsel %vm658_vm8, %v182_v61, %v691_v23  ;;  %v188_v35 = vsel %vm664_vm9, %v184_v63, %v695_v24  ;;  %v215_v44 = vsel %vm214_vm2, %v432_v26, %v433_v25  ;;  %v448_v47 = vunpack.i.h.bf16 %v647_v52 }
 0x10a   :  { %v217_v45 = vsel %vm214_vm2, %v433_v25, %v432_v26  ;;  %v447_v48 = vunpack.i.l.bf16 %v647_v52  ;;  %257 = vperm.xlu2 %489, %v254_v46  }
 0x10b   :  { %312 = vmatpush.msra.mxu2 %v216_v53  ;;  %332 = vmatpush.msra.mxu3 %v218_v54 }
 0x10c   :  { %v411_v55 = vpop.permute.xlu1 %410  ;;  %v461_v27 = vpop.permute.xlu2 %460  ;;  %v228_v52 = vsel %vm227_vm6, %v447_v48, %v448_v47 }
 0x10d   :  { %v413_v58 = vunpack.i.h.bf16 %v411_v55  ;;  %v412_v59 = vunpack.i.l.bf16 %v411_v55  ;;  %v451_v2 = vpop.permute.xlu0 %450 }
 0x10e   :  { %v453_v11 = vunpack.i.h.bf16 %v451_v2  ;;  %v452_v12 = vunpack.i.l.bf16 %v451_v2 }
 0x10f   :  { %v229_v3 = vsel %vm227_vm6, %v412_v59, %v413_v58  ;;  %v231_v4 = vsel %vm227_vm6, %v413_v58, %v412_v59  ;;  %v230_v58 = vsel %vm227_vm6, %v448_v47, %v447_v48 }
 0x110   :  { %v234_v5 = vsel %vm658_vm8, %v229_v3, %v182_v61  ;;  %v235_v6 = vsel %vm664_vm9, %v231_v4, %v184_v63  ;;  %v154_v15 = vsel %vm150_vm11, %v453_v11, %v452_v12  ;;  %v152_v16 = vsel %vm150_vm11, %v452_v12, %v453_v11 }
 0x111   :  { %313 = vmatpush.msra.mxu2 %v234_v5  ;;  %333 = vmatpush.msra.mxu3 %v235_v6  ;;  %v170_v40 = vsel %vm627_vm3, %v154_v15, %v167_v9  ;;  %v171_v41 = vsel %vm631_vm4, %v152_v16, %v165_v10  ;;  %v253_v15 = vld [vmem:[%s821_s1] sm:$0xff]  ;;  %s557_s1 = smov [#allocation5]  }
 0x112   :  { %s353_s8 = sshll.u32 %s557_s1, 4  ;;  %s354_s8 = int_to_ptr.vmem [resolvable:$true] %s353_s8 }
 0x113   :  { %314 = vmatpush.msra.mxu2 %v204_v21  ;;  %334 = vmatpush.msra.mxu3 %v205_v22 }
 0x114   :  { %v426_v29 = vpop.permute.xlu1 %425  ;;  %v476_v2 = vpop.permute.xlu2 %475 }
 0x115   :  { %v428_v30 = vunpack.i.h.bf16 %v426_v29  ;;  %v427_v32 = vunpack.i.l.bf16 %v426_v29  ;;  %315 = vmatpush.msra.mxu2 %v58_v19  ;;  %335 = vmatpush.msra.mxu3 %v59_v20  ;;  %v463_v19 = vunpack.i.h.bf16 %v461_v27  ;;  %v462_v20 = vunpack.i.l.bf16 %v461_v27  ;;  %v466_v55 = vpop.permute.xlu0 %465 }
 0x116   :  { %v468_v3 = vunpack.i.h.bf16 %v466_v55  ;;  %v467_v4 = vunpack.i.l.bf16 %v466_v55  ;;  %v478_v9 = vunpack.i.h.bf16 %v476_v2  ;;  %v477_v10 = vunpack.i.l.bf16 %v476_v2 }
 0x117   :  { %316 = vmatpush.msra.mxu2 %v187_v31  ;;  %336 = vmatpush.msra.mxu3 %v188_v35  ;;  %v245_v36 = vsel %vm244_vm1, %v427_v32, %v428_v30  ;;  %v247_v37 = vsel %vm244_vm1, %v428_v30, %v427_v32  ;;  %v111_v49 = vsel %vm107_vm12, %v463_v19, %v462_v20 }
 0x118   :  { %v249_v38 = vsel %vm627_vm3, %v198_v33, %v245_v36  ;;  %v250_v39 = vsel %vm631_vm4, %v200_v34, %v247_v37  ;;  %v109_v50 = vsel %vm107_vm12, %v462_v20, %v463_v19  ;;  %v123_v12 = vsel %vm120_vm10, %v468_v3, %v467_v4 }
 0x119   :  { %271 = vmatpush.msra.mxu0 %v249_v38  ;;  %291 = vmatpush.msra.mxu1 %v250_v39  ;;  %v121_v21 = vsel %vm120_vm10, %v467_v4, %v468_v3  ;;  %v151_v29 = vsel %vm150_vm11, %v477_v10, %v478_v9 }
 0x11a   :  { %317 = vmatpush.msra.mxu2 %v170_v40  ;;  %337 = vmatpush.msra.mxu3 %v171_v41 }
 0x11b   :  { %272 = vmatpush.msra.mxu0 %v215_v44  ;;  %292 = vmatpush.msra.mxu1 %v217_v45 }
 0x11c   :  { %318 = vmatpush.msra.mxu2 %v111_v49  ;;  %338 = vmatpush.msra.mxu3 %v109_v50  ;;  %v441_v51 = vpop.permute.xlu1 %440 }
 0x11d   :  { %v443_v53 = vunpack.i.h.bf16 %v441_v51  ;;  %v442_v54 = vunpack.i.l.bf16 %v441_v51  ;;  %v481_v11 = vpop.permute.xlu0 %480 }
 0x11e   :  { %v483_v22 = vunpack.i.h.bf16 %v481_v11  ;;  %v482_v25 = vunpack.i.l.bf16 %v481_v11 }
 0x11f   :  { %v181_v56 = vsel %vm180_vm5, %v442_v54, %v443_v53  ;;  %v183_v57 = vsel %vm180_vm5, %v443_v53, %v442_v54 }
 0x120   :  { %v232_v59 = vsel %vm658_vm8, %v228_v52, %v181_v56  ;;  %v233_v61 = vsel %vm664_vm9, %v230_v58, %v183_v57  ;;  %v185_v27 = vsel %vm658_vm8, %v181_v56, %v123_v12  ;;  %v186_v13 = vsel %vm664_vm9, %v183_v57, %v121_v21 }
 0x121   :  { %273 = vmatpush.msra.mxu0 %v232_v59  ;;  %293 = vmatpush.msra.mxu1 %v233_v61  ;;  %v110_v31 = vsel %vm107_vm12, %v483_v22, %v482_v25  ;;  %v108_v35 = vsel %vm107_vm12, %v482_v25, %v483_v22 }
 0x124   :  { %v456_v63 = vpop.permute.xlu1 %455 }
 0x125   :  { %v458_v0 = vunpack.i.h.bf16 %v456_v63  ;;  %v457_v1 = vunpack.i.l.bf16 %v456_v63 }
 0x127   :  { %v166_v5 = vsel %vm163_vm7, %v458_v0, %v457_v1  ;;  %v164_v6 = vsel %vm163_vm7, %v457_v1, %v458_v0 }
 0x128   :  { %v202_v7 = vsel %vm627_vm3, %v166_v5, %v198_v33  ;;  %v203_v8 = vsel %vm631_vm4, %v164_v6, %v200_v34  ;;  %v169_v32 = vsel %vm631_vm4, %v151_v29, %v164_v6 }
 0x129   :  { %274 = vmatpush.msra.mxu0 %v202_v7  ;;  %294 = vmatpush.msra.mxu1 %v203_v8 }
 0x12b   :  { %275 = vmatpush.msra.mxu0 %v56_v17  ;;  %295 = vmatpush.msra.mxu1 %v57_v18  ;;  %v153_v18 = vsel %vm150_vm11, %v478_v9, %v477_v10 }
 0x12c   :  { %v471_v26 = vpop.permute.xlu1 %470  ;;  %v168_v30 = vsel %vm627_vm3, %v153_v18, %v166_v5 }
 0x12d   :  { %v473_v17 = vunpack.i.h.bf16 %v471_v26  ;;  %v472_v14 = vunpack.i.l.bf16 %v471_v26  ;;  %276 = vmatpush.msra.mxu0 %v185_v27  ;;  %296 = vmatpush.msra.mxu1 %v186_v13 }
 0x12f   :  { %277 = vmatpush.msra.mxu0 %v168_v30  ;;  %297 = vmatpush.msra.mxu1 %v169_v32  ;;  %v137_v33 = vsel %vm133_vm13, %v473_v17, %v472_v14  ;;  %v135_v34 = vsel %vm133_vm13, %v472_v14, %v473_v17 }
 0x130   :  { %v140_v42 = vsel %vm658_vm8, %v691_v23, %v137_v33  ;;  %v141_v43 = vsel %vm664_vm9, %v695_v24, %v135_v34 }
 0x131   :  { %278 = vmatpush.msra.mxu0 %v110_v31  ;;  %298 = vmatpush.msra.mxu1 %v108_v35 }
 0x132   :  { %319 = vmatpush.msra.mxu2 %v140_v42  ;;  %339 = vmatpush.msra.mxu3 %v141_v43 }
 0x133   :  { %370 = vmatmul.msk.f32.vlgmr.msra.gmra.mxu2 %vm260_vm14, %v253_v15  ;;  %371 = vmatmul.msk.f32.vlgmr.msra.gmra.mxu3 %vm260_vm14, %v253_v15 }
 0x134   :  { %v486_v16 = vpop.permute.xlu1 %485 }
 0x135   :  { %v488_v19 = vunpack.i.h.bf16 %v486_v16  ;;  %v487_v20 = vunpack.i.l.bf16 %v486_v16 }
 0x137   :  { %v136_v23 = vsel %vm133_vm13, %v488_v19, %v487_v20  ;;  %v134_v24 = vsel %vm133_vm13, %v487_v20, %v488_v19 }
 0x138   :  { %v138_v36 = vsel %vm658_vm8, %v123_v12, %v136_v23  ;;  %v139_v37 = vsel %vm664_vm9, %v121_v21, %v134_v24 }
 0x139   :  { %279 = vmatpush.msra.mxu0 %v138_v36  ;;  %299 = vmatpush.msra.mxu1 %v139_v37 }
 0x13a   :  { %368 = vmatmul.msk.f32.vlgmr.msra.gmra.mxu0 %vm260_vm14, %v253_v15  ;;  %369 = vmatmul.msk.f32.vlgmr.msra.gmra.mxu1 %vm260_vm14, %v253_v15 }
 0x164   :  { %v258_v38 = vpop.permute.xlu2 %257 }
 0x1b6   :  { %v321_v39 = vpop.f32.mrf.mxu2  ;;  %v341_v40 = vpop.f32.mrf.mxu3 }
 0x1b7   :  { %v281_v41 = vpop.f32.mrf.mxu0  ;;  %v301_v44 = vpop.f32.mrf.mxu1  ;;  %v322_v45 = vadd.f32 %v321_v39, %v258_v38  ;;  %v342_v62 = vadd.f32 %v341_v40, %v258_v38 }
 0x1b8   :  { %v282_v28 = vadd.f32 %v281_v41, %v258_v38  ;;  %v302_v60 = vadd.f32 %v301_v44, %v258_v38 }
 0x1b9   :  { %347 = vst [vmem:[#allocation5 + $0x10] sm:$0xff] %v322_v45 }
 0x1ba   :  { %344 = vst [vmem:[#allocation5] sm:$0xff] %v282_v28 }
 0x1bb   :  { %345 = vst [vmem:[#allocation5 + $0x8] sm:$0xff] %v302_v60 }
 0x1bc   :  { %348 = vst [vmem:[#allocation5 + $0x18] sm:$0xff] %v342_v62 }
 0x1bd   :  { %361 = dma.vmem_to_hbm [thread:$0]  %s354_s8, 512, %s356_s11, [#allocation4], %s544_s20, %s544_s20, %s545_s21  }
 0x1be   :  { %541 = dma.done.wait [#allocation4], 512  }
 0x1bf   :  { %542 = vsyncadd [#allocation4], 4294966784 }
 0x1c0   :  { %366 = vsyncpa [#allocation3], 1 }
 0x1c1   :  { %367 = vsyncpa [#allocation4], 1 }

</bundles_post_ra>
